<compile_context>
chip_gen: v7x
topology: tpu7x:2x2x1
jax: 0.10.0
libtpu: 0.0.40
codegen_flags: <defaults>
</compile_context>

<pallas_src>
import functools

import jax
import jax.numpy as jnp
from jax.experimental import pallas as pl
from jax.experimental.pallas import tpu as pltpu


def _round_up(x, m):
    return (x + m - 1) // m * m


def _round_dn(x, m):
    return x // m * m


def _pool_project_normalize_kernel(x_ref, w_hbm_ref, o_ref,
                                   acc_ref, w_vmem_ref, w_sem,
                                   *, inv_hw, eps, hw, thw, needs_mask):
    # x_ref:      (TN, C_in, THW)    activation tile (native dtype, cast to f32 here)
    # w_hbm_ref:  (C_in, C_out_pad)  pre-transposed weight, left in HBM (pl.ANY)
    # o_ref:      (TN, C_out_pad)    normalized features
    # acc_ref:    (TN, C_in)         f32 running spatial SUM (VMEM scratch)
    # w_vmem_ref: (C_in, C_out_pad)  single-buffered weight landing buffer
    # w_sem:      DMA semaphore for the weight copy
    k = pl.program_id(1)

    @pl.when(k == 0)
    def _init():
        acc_ref[...] = jnp.zeros_like(acc_ref)
        # One weight DMA per batch tile: overlaps the whole streaming reduction and is
        # consumed only in the finalize step.  Single VMEM copy (no pipeline double
        # buffer) -> more VMEM left for the x tile, important on v7x's 64 MiB.
        pltpu.make_async_copy(w_hbm_ref, w_vmem_ref, w_sem).start()

    # Streaming spatial reduction for this HW tile (mem-bound; compute hides under DMA).
    x = x_ref[...].astype(jnp.float32)
    if needs_mask:
        # Zero the ragged HW tail of the last tile instead of padding in HBM.
        col = jax.lax.broadcasted_iota(jnp.int32, x.shape, 2) + k * thw
        x = jnp.where(col < hw, x, 0.0)
    acc_ref[...] += jnp.sum(x, axis=-1)

    @pl.when(k == pl.num_programs(1) - 1)
    def _finalize():
        pltpu.make_async_copy(w_hbm_ref, w_vmem_ref, w_sem).wait()
        # Divide by the TRUE HW only here (masked / absent tail contributes 0).
        pooled = acc_ref[...] * inv_hw                                # (TN, C_in)
        feat = jnp.dot(pooled, w_vmem_ref[...],
                       preferred_element_type=jnp.float32,
                       precision=jax.lax.Precision.HIGHEST)           # (TN, C_out_pad)
        # F.normalize(dim=1, p=2): x / max(||x||,eps) == x * rsqrt(max(||x||^2, eps^2)).
        # Zero-padded C_out columns carry zero weight -> contribute 0 to the norm.
        # Any out-of-range batch rows (ragged last block) are dropped on the store.
        sq = jnp.sum(feat * feat, axis=-1, keepdims=True)
        inv_norm = jax.lax.rsqrt(jnp.maximum(sq, eps * eps))          # EUP rsqrt
        o_ref[...] = (feat * inv_norm).astype(o_ref.dtype)


def model_with_normalize(samples, w, *, tn=None, thw=None, eps=1e-12):
    """samples: (N, C_in, H, W); w: (C_out, C_in) synthetic 1x1-conv weight."""
    n, c_in, h, wdt = samples.shape
    c_out = w.shape[0]
    hw = h * wdt

    c_out_pad = _round_up(c_out, 128)            # lane-dense output stores
    itemsize = jnp.dtype(samples.dtype).itemsize  # bf16 inputs stream at half the bytes

    # ---- batch tile ---------------------------------------------------------------
    if tn is None:
        tn = 128                                  # sane MXU M-dim / fewer finalizes
    if n <= tn:
        # Ensure >=2 "parallel" batch blocks when N >= 16 (v7x: feed both TensorCores);
        # otherwise a single exact block (block dims == full array dims).
        tn = max(8, _round_dn(n // 2, 8)) if n >= 16 else n
    else:
        tn = max(8, _round_dn(tn, 8))
        if n >= 16:
            tn = min(tn, max(8, _round_dn(n // 2, 8)))

    # ---- generation-aware VMEM budget ----------------------------------------------
    try:
        vmem_cap = int(pltpu.get_tpu_info().vmem_capacity_bytes)
    except Exception:                             # pragma: no cover - conservative fallback
        vmem_cap = 64 * 1024 * 1024               # v7x-safe
    vmem_limit = min(vmem_cap * 3 // 4, 96 * 1024 * 1024)  # 96 MiB on v5e/v6e, 48 MiB on v7x

    c_in_sub = _round_up(c_in, 8)
    w_bytes = c_in_sub * c_out_pad * 4            # single-buffered weight scratch
    slack = 4 * 1024 * 1024                       # compiler-internal scratch headroom

    def _max_thw_for(tn_):
        out_b = 2 * _round_up(tn_, 8) * c_out_pad * 4
        acc_b = _round_up(tn_, 8) * _round_up(c_in, 128) * 4
        x_budget = vmem_limit - w_bytes - out_b - acc_b - slack
        per_buf = max(x_budget, 0) // 2           # x block is double-buffered by Pallas
        return _round_dn(per_buf // max(tn_ * c_in_sub * itemsize, 1), 128)

    max_thw = _max_thw_for(tn)
    while tn > 8 and max_thw < 512:               # keep long contiguous DMA rows
        new_tn = max(8, _round_dn(tn // 2, 8))
        if new_tn == tn:
            break
        tn = new_tn
        max_thw = _max_thw_for(tn)
    max_thw = max(128, max_thw)

    # ---- HW tile (balanced; ragged tail handled in-kernel, never padded in HBM) ----
    if thw is not None:
        thw = max(128, _round_up(thw, 128))
        if thw >= hw:
            thw = hw                              # single full-dim block
    elif hw <= max_thw:
        thw = hw                                  # single full-dim block (any hw)
    else:
        n_k = pl.cdiv(hw, max_thw)
        thw = _round_up(pl.cdiv(hw, n_k), 128)    # balanced tiles, multiple of 128

    grid_i = pl.cdiv(n, tn)
    grid_k = pl.cdiv(hw, thw)                     # reduction (HW) axis last
    needs_mask = (hw % thw) != 0

    # Free layout plumbing: merge contiguous spatial dims (no copy); tiny weight prep.
    x = samples.reshape(n, c_in, hw)
    wt = jnp.zeros((c_in, c_out_pad), jnp.float32).at[:, :c_out].set(
        w.astype(jnp.float32).T)

    kernel = functools.partial(
        _pool_project_normalize_kernel,
        inv_hw=1.0 / float(hw), eps=float(eps), hw=hw, thw=thw, needs_mask=needs_mask)

    out = pl.pallas_call(
        kernel,
        out_shape=jax.ShapeDtypeStruct((n, c_out_pad), jnp.float32),
        grid_spec=pltpu.PrefetchScalarGridSpec(
            num_scalar_prefetch=0,
            grid=(grid_i, grid_k),
            in_specs=[
                pl.BlockSpec((tn, c_in, thw), lambda i, k: (i, 0, k)),
                pl.BlockSpec(memory_space=pl.ANY),          # weight stays in HBM
            ],
            out_specs=pl.BlockSpec((tn, c_out_pad), lambda i, k: (i, 0)),
            scratch_shapes=[
                pltpu.VMEM((tn, c_in), jnp.float32),         # running spatial sum
                pltpu.VMEM((c_in, c_out_pad), jnp.float32),  # single-buffered weight
                pltpu.SemaphoreType.DMA,
            ],
        ),
        compiler_params=pltpu.CompilerParams(
            dimension_semantics=("parallel", "arbitrary"),
            vmem_limit_bytes=int(vmem_limit),
        ),
    )(x, wt)

    return out[:, :c_out]


def _reference(samples, w):
    # Pure-JAX reference of the PyTorch semantics:
    #   feat = 1x1 conv(samples); pooled = AdaptiveAvgPool2d(1)(feat).squeeze()
    #   out  = F.normalize(pooled, dim=1, p=2)
    feat = jnp.einsum("oc,nchw->nohw", w, samples.astype(jnp.float32))
    pooled = jnp.mean(feat, axis=(2, 3))
    norm = jnp.sqrt(jnp.sum(pooled * pooled, axis=1, keepdims=True))
    return pooled / jnp.maximum(norm, 1e-12)


if __name__ == "__main__":
    # Small, forward-consistent shapes: batch=2, in-channels=4, spatial=16x16,
    # synthetic-backbone feature channels=32.
    N, C_IN, H, W = 2, 4, 16, 16
    C_OUT = 32

    key = jax.random.PRNGKey(0)
    kx, kw, kx2 = jax.random.split(key, 3)
    samples = jax.random.normal(kx, (N, C_IN, H, W), dtype=jnp.float32)
    w = 0.1 * jax.random.normal(kw, (C_OUT, C_IN), dtype=jnp.float32)

    ref = _reference(samples, w)

    # Default tiling (single reduction step, exact blocks everywhere).
    out = jax.block_until_ready(model_with_normalize(samples, w))
    assert out.shape == (N, C_OUT)
    assert jnp.allclose(out, ref, atol=1e-5, rtol=1e-5), "mismatch vs reference (default)"
    assert jnp.allclose(jnp.linalg.norm(out, axis=1), 1.0, atol=1e-5)

    # Force a 2-step streaming HW reduction (exact split) to exercise init/acc/finalize.
    out2 = jax.block_until_ready(model_with_normalize(samples, w, thw=128))
    assert jnp.allclose(out2, ref, atol=1e-5, rtol=1e-5), "mismatch vs reference (tiled HW)"

    # Ragged HW tail (192 = 128 + 64, masked in-kernel, no HBM padding) plus two
    # batch blocks on the "parallel" axis.
    N2, H2, W2 = 16, 16, 12
    samples2 = jax.random.normal(kx2, (N2, C_IN, H2, W2), dtype=jnp.float32)
    ref2 = _reference(samples2, w)
    out3 = jax.block_until_ready(model_with_normalize(samples2, w, thw=128))
    assert out3.shape == (N2, C_OUT)
    assert jnp.allclose(out3, ref2, atol=1e-5, rtol=1e-5), "mismatch vs reference (ragged HW)"

    print("KERNEL_OK")
</pallas_src>

<mosaic_0001>
module attributes {stable_mosaic.version = 11 : i64} {
  func.func @_pool_project_normalize_kernel(%arg0: i32, %arg1: i32, %arg2: memref<2x4x256xf32, #tpu.memory_space<vmem>>, %arg3: memref<4x128xf32, #tpu.memory_space<any>>, %arg4: memref<2x128xf32, #tpu.memory_space<vmem>>, %arg5: memref<2x4xf32, #tpu.memory_space<vmem>>, %arg6: memref<4x128xf32, #tpu.memory_space<vmem>>, %arg7: memref<!tpu.dma_semaphore, #tpu.memory_space<semaphore_mem>>) attributes {dimension_semantics = [#tpu.dimension_semantics<parallel>, #tpu.dimension_semantics<arbitrary>], iteration_bounds = array<i64: 1, 1>, scalar_prefetch = 0 : i64, scratch_operands = 3 : i64, tpu.core_type = #tpu.core_type<tc>, window_params = [{transform_indices = @transform_0, window_bounds = array<i64: 2, 4, 256>}, {}, {transform_indices = @transform_2, window_bounds = array<i64: 2, 128>}]} {
    %c0_i32 = arith.constant 0 : i32
    %0 = arith.cmpi eq, %arg1, %c0_i32 : i32
    %1 = arith.extui %0 : i1 to i32
    %c0_i32_0 = arith.constant 0 : i32
    %2 = arith.cmpi ne, %1, %c0_i32_0 : i32
    scf.if %2 {
      %cst_9 = arith.constant 0.000000e+00 : f32
      %11 = vector.broadcast %cst_9 : f32 to vector<2x4xf32>
      %c0_10 = arith.constant 0 : index
      %c0_11 = arith.constant 0 : index
      %12 = vector.load %arg5[%c0_10, %c0_11] : memref<2x4xf32, #tpu.memory_space<vmem>>, vector<2x4xf32>
      tpu.vector_store %arg5[%c0_10, %c0_11], %11 {strides = array<i32>} : memref<2x4xf32, #tpu.memory_space<vmem>>, vector<2x4xf32>,
      tpu.enqueue_dma source(%arg3 : memref<4x128xf32, #tpu.memory_space<any>>) target(%arg6 : memref<4x128xf32, #tpu.memory_space<vmem>>) target_semaphore(%arg7 : memref<!tpu.dma_semaphore, #tpu.memory_space<semaphore_mem>>)
    } else {
    }
    %c0 = arith.constant 0 : index
    %c0_1 = arith.constant 0 : index
    %c0_2 = arith.constant 0 : index
    %3 = vector.load %arg2[%c0, %c0_1, %c0_2] : memref<2x4x256xf32, #tpu.memory_space<vmem>>, vector<2x4x256xf32>
    %c0_3 = arith.constant 0 : index
    %c0_4 = arith.constant 0 : index
    %4 = vector.load %arg5[%c0_3, %c0_4] : memref<2x4xf32, #tpu.memory_space<vmem>>, vector<2x4xf32>
    %cst = arith.constant dense<0.000000e+00> : vector<2x4xf32>
    %5 = vector.multi_reduction <add>, %3, %cst [2] : vector<2x4x256xf32> to vector<2x4xf32>
    %6 = arith.addf %4, %5 : vector<2x4xf32>
    %c0_5 = arith.constant 0 : index
    %c0_6 = arith.constant 0 : index
    %7 = vector.load %arg5[%c0_5, %c0_6] : memref<2x4xf32, #tpu.memory_space<vmem>>, vector<2x4xf32>
    tpu.vector_store %arg5[%c0_5, %c0_6], %6 {strides = array<i32>} : memref<2x4xf32, #tpu.memory_space<vmem>>, vector<2x4xf32>,
    %c0_i32_7 = arith.constant 0 : i32
    %8 = arith.cmpi eq, %arg1, %c0_i32_7 : i32
    %9 = arith.extui %8 : i1 to i32
    %c0_i32_8 = arith.constant 0 : i32
    %10 = arith.cmpi ne, %9, %c0_i32_8 : i32
    scf.if %10 {
      tpu.wait_dma2 semaphore(%arg7 : memref<!tpu.dma_semaphore, #tpu.memory_space<semaphore_mem>>) src(%arg3 : memref<4x128xf32, #tpu.memory_space<any>>) dst(%arg6 : memref<4x128xf32, #tpu.memory_space<vmem>>)
      %c0_9 = arith.constant 0 : index
      %c0_10 = arith.constant 0 : index
      %11 = vector.load %arg5[%c0_9, %c0_10] : memref<2x4xf32, #tpu.memory_space<vmem>>, vector<2x4xf32>
      %cst_11 = arith.constant 3.906250e-03 : f32
      %12 = vector.broadcast %cst_11 : f32 to vector<2x4xf32>
      %13 = arith.mulf %11, %12 : vector<2x4xf32>
      %c0_12 = arith.constant 0 : index
      %c0_13 = arith.constant 0 : index
      %14 = vector.load %arg6[%c0_12, %c0_13] : memref<4x128xf32, #tpu.memory_space<vmem>>, vector<4x128xf32>
      %cst_14 = arith.constant dense<0.000000e+00> : vector<2x128xf32>
      %15 = tpu.matmul %13, %14, %cst_14 {dimension_numbers = #tpu.dot_dimension_numbers<[1], [0], [0], [1], [0, 0, 1, 1], [], []>, precision = #tpu.contract_precision<fp32>} : vector<2x4xf32>, vector<4x128xf32>, vector<2x128xf32> -> vector<2x128xf32>
      %16 = arith.mulf %15, %15 : vector<2x128xf32>
      %cst_15 = arith.constant dense<0.000000e+00> : vector<2xf32>
      %17 = vector.multi_reduction <add>, %16, %cst_15 [1] : vector<2x128xf32> to vector<2xf32>
      %18 = vector.shape_cast %17 : vector<2xf32> to vector<2x1xf32>
      %cst_16 = arith.constant 1.000000e-24 : f32
      %19 = vector.broadcast %cst_16 : f32 to vector<2x1xf32>
      %20 = arith.maximumf %18, %19 : vector<2x1xf32>
      %21 = math.rsqrt %20 : vector<2x1xf32>
      %22 = vector.broadcast %21 : vector<2x1xf32> to vector<2x128xf32>
      %23 = arith.mulf %15, %22 : vector<2x128xf32>
      %c0_17 = arith.constant 0 : index
      %c0_18 = arith.constant 0 : index
      %24 = vector.load %arg4[%c0_17, %c0_18] : memref<2x128xf32, #tpu.memory_space<vmem>>, vector<2x128xf32>
      tpu.vector_store %arg4[%c0_17, %c0_18], %23 {strides = array<i32>} : memref<2x128xf32, #tpu.memory_space<vmem>>, vector<2x128xf32>,
    } else {
    }
    return
  }
  func.func @transform_0(%arg0: i32, %arg1: i32) -> (i32, i32, i32) {
    %c0_i32 = arith.constant 0 : i32
    %c0_i32_0 = arith.constant 0 : i32
    return %arg0, %c0_i32, %arg1 : i32, i32, i32
  }
  func.func @transform_2(%arg0: i32, %arg1: i32) -> (i32, i32) {
    %c0_i32 = arith.constant 0 : i32
    %c0_i32_0 = arith.constant 0 : i32
    return %arg0, %c0_i32 : i32, i32
  }
}

</mosaic_0001>

<bundles_post_ra>
// kernel: tpu_custom_call.1
= control target key start
LH: loop header
LB: loop body
LE: loop exit
PB: predicated region body
PF: predicated region fallthrough
CT: control target
= control target key end

     0   :  { %7 = vsyncpa [#allocation6], 0  ;;  %s790_s0 = inlined_call_operand.hbm [shape: f32[2,4,256], index: 0, kind: input, shape index: {}]   ;;  %s791_s1 = inlined_call_operand.hbm [shape: f32[4,128], index: 1, kind: input, shape index: {}]   ;;  %s792_s2 = inlined_call_operand.hbm [shape: f32[2,128], index: 2, kind: output, shape index: {}]  }
   0x1   :  { %8 = vsyncpa [#allocation7], 0  ;;  %s706_s9 = smov [#allocation5]   ;;  %s634_s13 = scalar_lea.hbm %s790_s0, 256 }
   0x2   :  { %s14_s10 = sshll.u32 %s706_s9, 4  ;;  %p635_p0 = scmp.ne.s32.totalorder %s790_s0, %s634_s13  ;;  %s15_s10 = int_to_ptr.vmem [resolvable:$true] %s14_s10 }
   0x3   :  { %p638_p1 = scmp.lt.u32.totalorder %s634_s13, %s790_s0 }
   0x5   :  { %p640_p2 = pnand %p638_p1, %p635_p0 }
   0x7   :  { %643 = shalt.err (!%p640_p2)
}
   0x8   :  { %s644_s18 = scalar_lea.vmem %s15_s10, 256  ;;  %p649_p4 = scmp.lt.s32.totalorder %s15_s10, %s15_s10 }
   0x9   :  { %p645_p3 = scmp.ne.s32.totalorder %s15_s10, %s644_s18  ;;  %p650_p5 = scmp.lt.s32.totalorder %s644_s18, %s644_s18 }
   0xb   :  { %p651_p6 = por %p650_p5, %p649_p4 }
   0xd   :  { %p652_p7 = pnand %p651_p6, %p645_p3 }
   0xf   :  { %655 = shalt.err (!%p652_p7)
}
  0x10   :  { %s707_s19 = smov 128   ;;  %s708_s20 = smov 8  }
  0x11   :  { %20 = dma.hbm_to_vmem [thread:$0]  %s790_s0, 256, %s15_s10, [#allocation6], %s707_s19, %s707_s19, %s708_s20  }
  0x12   :  { %700 = dma.done.wait [#allocation6], 256  }
  0x13   :  { %701 = vsyncadd [#allocation6], 4294967040  ;;  %vm28_vm0 = vcmask 25600   ;;  %v709_v0 = vmov 0.0   ;;  %vm50_vm1 = vcmask 1043456   ;;  %v41_v1 = vld [vmem:[#allocation5] sm:$0xff] }
  0x14   :  { %29 = vst.msk [vmem:[#allocation2] sm:$0x3] %vm28_vm0, %v709_v0  ;;  %v42_v2 = vld [vmem:[#allocation5 + $0x8] sm:$0xff]  ;;  %v46_v3 = vcombine.high %v41_v1, %v41_v1  ;;  %v51_v4 = vsel %vm50_vm1, %v41_v1, 0.0  ;;  %s710_s0 = smov [#allocation3]   ;;  %s656_s26 = scalar_lea.hbm %s791_s1, 64 }
  0x15   :  { %v47_v5 = vcombine.high %v42_v2, %v42_v2  ;;  %v56_v7 = vsel %vm50_vm1, %v42_v2, 0.0  ;;  %s37_s23 = sshll.u32 %s710_s0, 4  ;;  %p657_p8 = scmp.ne.s32.totalorder %s791_s1, %s656_s26  ;;  %s38_s23 = int_to_ptr.vmem [resolvable:$true] %s37_s23 }
  0x16   :  { %v52_v6 = vsel %vm50_vm1, %v46_v3, 0.0  ;;  %p660_p9 = scmp.lt.u32.totalorder %s656_s26, %s791_s1 }
  0x17   :  { %v57_v8 = vsel %vm50_vm1, %v47_v5, 0.0  ;;  %v53_v9 = vadd.f32 %v52_v6, %v51_v4 }
  0x18   :  { %v58_v10 = vadd.f32 %v57_v8, %v56_v7  ;;  %p662_p10 = pnand %p660_p9, %p657_p8 }
  0x19   :  { %54 = vadd.xlane.f32.xlu0 %v53_v9 }
  0x1d   :  { %59 = vadd.xlane.f32.xlu0 %v58_v10 }
  0x1e   :  { %665 = shalt.err (!%p662_p10)  }
  0x1f   :  { %s666_s3 = scalar_lea.vmem %s38_s23, 64  ;;  %p671_p12 = scmp.lt.s32.totalorder %s38_s23, %s38_s23 }
  0x20   :  { %p667_p11 = scmp.ne.s32.totalorder %s38_s23, %s666_s3  ;;  %p672_p13 = scmp.lt.s32.totalorder %s666_s3, %s666_s3 }
  0x22   :  { %p673_p0 = por %p672_p13, %p671_p12 }
  0x24   :  { %p674_p1 = pnand %p673_p0, %p667_p11 }
  0x26   :  { %677 = shalt.err (!%p674_p1)  }
  0x27   :  { %40 = dma.hbm_to_vmem [thread:$0]  %s791_s1, 64, %s38_s23, [#allocation4]  ;;  %v63_v11 = vlaneseq  ;;  %vm73_vm2 = vcmask 1041409   ;;  %v43_v18 = vld [vmem:[#allocation2] sm:$0x3] }
  0x29   :  { %v64_v12 = vand.u32 127, %v63_v11  ;;  %v66_v13 = vshrl.u32 %v63_v11, 7 }
  0x2b   :  { %v67_v15 = vsub.s32 %v64_v12, %v66_v13 }
  0xa6   :  { %v55_v14 = vpop.xlane.xlu0 %54 }
  0xa7   :  { %v68_v17 = vrot.slane %v55_v14, %v67_v15 }
  0xaa   :  { %v60_v16 = vpop.xlane.xlu0 %59 }
  0xab   :  { %v72_v19 = vrot.slane %v60_v16, %v67_v15 }
  0xad   :  { %v74_v20 = vsel %vm73_vm2, %v72_v19, %v68_v17 }
  0xae   :  { %v76_v21 = vadd.f32 %v74_v20, %v43_v18 }
  0xb0   :  { %78 = vst.msk [vmem:[#allocation2] sm:$0x3] %vm28_vm0, %v76_v21 }
  0xb1   :  { %702 = dma.done.wait [#allocation4], 64 }
  0xb2   :  { %703 = vsyncadd [#allocation4], 4294967232  ;;  %599 = vmatprep.subr.mxu0 %v709_v0  ;;  %584 = vmatprep.subr.mxu1 %v709_v0  ;;  %vm711_vm3 = vmmov 0   ;;  %v87_v22 = vld [vmem:[#allocation3] sm:$0xf]  ;;  %vm88_vm4 = vcmask 31744  }
  0xb3   :  { %601 = vmatprep.mubr.msk.f32.mxu0 %vm711_vm3, %v709_v0  ;;  %586 = vmatprep.mubr.msk.f32.mxu1 %vm711_vm3, %v709_v0  ;;  %v93_v24 = vsel %vm50_vm1, %v87_v22, 0  ;;  %vm542_vm5 = vcmask 1041408   ;;  %s712_s1 = smov [#allocation8]  }
  0xb4   :  { %v96_v26 = vand.u32 4294901760, %v93_v24  ;;  %s556_s6 = sshll.u32 %s712_s1, 4  ;;  %s557_s6 = int_to_ptr.vmem [resolvable:$true] %s556_s6 }
  0xb5   :  { %s678_s7 = scalar_lea.vmem %s557_s6, 32  ;;  %p683_p3 = scmp.lt.s32.totalorder %s557_s6, %s557_s6 }
  0xb6   :  { %v173_v28 = vsub.f32 %v93_v24, %v96_v26  ;;  %600 = vmatpush3.msra.mxu0 %v96_v26  ;;  %585 = vmatpush3.msra.mxu1 %v96_v26  ;;  %p679_p2 = scmp.ne.s32.totalorder %s557_s6, %s678_s7  ;;  %p684_p4 = scmp.lt.s32.totalorder %s678_s7, %s678_s7 }
  0xb7   :  { %v85_v23 = vld [vmem:[#allocation2] sm:$0x3]  ;;  %589 = vmatprep.subr.mxu1 %v709_v0  ;;  %604 = vmatprep.subr.mxu0 %v709_v0 }
  0xb8   :  { %v86_v25 = vmul.f32 0.00390625, %v85_v23  ;;  %v174_v31 = vand.u32 4294901760, %v173_v28  ;;  %p685_p5 = por %p684_p4, %p683_p3 }
  0xba   :  { %v90_v27 = vsel %vm88_vm4, %v86_v25, 0  ;;  %v175_v33 = vsub.f32 %v173_v28, %v174_v31  ;;  %p686_p6 = pnand %p685_p5, %p679_p2 }
  0xbb   :  { %v161_v29 = vand.u32 4294901760, %v90_v27 }
  0xbc   :  { %v176_v35 = vand.u32 4294901760, %v175_v33 }
  0xbd   :  { %v162_v30 = vsub.f32 %v90_v27, %v161_v29 }
  0xbf   :  { %v163_v32 = vand.u32 4294901760, %v162_v30 }
  0xc1   :  { %602 = vmatmul.mubr.f32.vlgmr.msra.gmra.mrb[0].mxu0 %v163_v32  ;;  %v164_v34 = vsub.f32 %v162_v30, %v163_v32 }
  0xc2   :  { %605 = vmatpush3.msra.mxu0 %v174_v31  ;;  %606 = vmatprep.mubr.msk.f32.mxu0 %vm711_vm3, %v709_v0 }
  0xc3   :  { %v165_v36 = vand.u32 4294901760, %v164_v34  ;;  %609 = vmatprep.subr.mxu0 %v709_v0 }
  0xc5   :  { %587 = vmatmul.mubr.f32.vlgmr.msra.gmra.mrb[0].mxu1 %v165_v36 }
  0xc6   :  { %590 = vmatpush3.msra.mxu1 %v176_v35  ;;  %591 = vmatprep.mubr.msk.f32.mxu1 %vm711_vm3, %v709_v0 }
  0xc7   :  { %594 = vmatprep.subr.mxu1 %v709_v0 }
  0xc9   :  { %607 = vmatmul.mubr.f32.vlgmr.msra.gmra.mrb[0].mxu0 %v161_v29 }
  0xca   :  { %610 = vmatpush3.msra.mxu0 %v96_v26  ;;  %611 = vmatprep.mubr.msk.f32.mxu0 %vm711_vm3, %v709_v0 }
  0xcd   :  { %592 = vmatmul.mubr.f32.vlgmr.msra.gmra.mrb[0].mxu1 %v161_v29 }
  0xce   :  { %595 = vmatpush3.msra.mxu1 %v173_v28  ;;  %596 = vmatprep.mubr.msk.f32.mxu1 %vm711_vm3, %v709_v0 }
  0xd1   :  { %612 = vmatmul.mubr.f32.vlgmr.msra.gmra.mrb[0].mxu0 %v161_v29 }
  0xd5   :  { %597 = vmatmul.mubr.f32.vlgmr.msra.gmra.mrb[0].mxu1 %v162_v30 }
 0x1a4   :  { %v537_v37 = vpop.f32.mrb[0].mxu0 }
 0x1a5   :  { %v613_v38 = vpop.f32.mrb[1].mxu0 }
 0x1a8   :  { %v317_v39 = vpop.f32.mrb[0].mxu1 }
 0x1a9   :  { %v614_v40 = vadd.f32 %v537_v37, %v317_v39  ;;  %v598_v41 = vpop.f32.mrb[1].mxu1 }
 0x1ab   :  { %v541_v42 = vmul.f32 %v614_v40, %v614_v40 }
 0x1ad   :  { %v543_v43 = vsel %vm542_vm5, %v541_v42, 0.0 }
 0x1ae   :  { %544 = vadd.xlane.f32.xlu0 %v543_v43 }
 0x23b   :  { %v545_v44 = vpop.xlane.xlu0 %544 }
 0x23c   :  { %v546_v45 = vmax.f32 %v545_v44, 1e-24 }
 0x23e   :  { %632 = vrsqrt.f32 %v546_v45 }
 0x248   :  { %v633_v46 = vpop.eup %632 }
 0x249   :  { %v548_v47 = vmul.f32 %v633_v46, %v614_v40 }
 0x24b   :  { %549 = vst [vmem:[#allocation8] sm:$0x3] %v548_v47 }
 0x24c   :  { %689 = shalt.err (!%p686_p6)
}
 0x24d   :  { %s690_s10 = scalar_lea.hbm %s792_s2, 32 }
 0x24e   :  { %p691_p7 = scmp.ne.s32.totalorder %s792_s2, %s690_s10  ;;  %p694_p8 = scmp.lt.u32.totalorder %s690_s10, %s792_s2 }
 0x250   :  { %p696_p9 = pnand %p694_p8, %p691_p7 }
 0x252   :  { %699 = shalt.err (!%p696_p9)
}
 0x253   :  { %559 = dma.vmem_to_hbm [thread:$0]  %s557_s6, 32, %s792_s2, [#allocation7]  }
 0x254   :  { %704 = dma.done.wait [#allocation7], 32  }
 0x255   :  { %705 = vsyncadd [#allocation7], 4294967264 }
 0x256   :  { %563 = vsyncpa [#allocation6], 1 }
 0x257   :  { %564 = vsyncpa [#allocation7], 1 }
 0x258   :  { %565 = vsyncmov [#allocation4] }
 0x25b   :  { %s566_s17 = vpop.sfrf %565 }
 0x25c   :  { %p571_p10 = scmp.ne.s32.totalorder %s566_s17, 0 }
 0x25e   :  { %570 = shalt.err (%p571_p10)  }

</bundles_post_ra>
